<compile_context>
chip_gen: v7x
topology: tpu7x:2x2x1
jax: 0.10.0
libtpu: 0.0.40
codegen_flags: <defaults>
</compile_context>

<pallas_src>
import functools

import jax
import jax.numpy as jnp
import numpy as np
from jax.experimental import pallas as pl
from jax.experimental.pallas import tpu as pltpu

LANE = 128  # TPU lane width; node and feature dims are padded to this


# ----------------------------- Pallas kernel ------------------------------ #
def fused_gcn_kernel(a_ref, x_ref, w_ref, b_ref, o_ref, *, num_layers):
    a = a_ref[...]                       # (Np, Np) bf16, resident across all layers
    h = x_ref[...]                       # (Np, Fp) bf16, padded node features
    for i in range(num_layers):          # static unroll: whole network in one call
        w = w_ref[i]                     # (Fp, Fp) bf16, zero-padded W^T
        b = b_ref[i]                     # (1, Fp)  f32,  zero-padded bias
        # linear: h @ W^T + b (MXU bf16 inputs, f32 accumulation)
        z = jnp.dot(h, w, preferred_element_type=jnp.float32) + b
        # message passing: h'[v] = sum_u A[v, u] * z[u]  ==  A @ z
        y = jnp.dot(a, z.astype(jnp.bfloat16),
                    preferred_element_type=jnp.float32)
        if i != num_layers - 1:
            y = jnp.maximum(y, 0.0)      # ReLU epilogue kept in f32
            h = y.astype(jnp.bfloat16)   # next layer's bf16 MXU input
        else:
            o_ref[...] = y.astype(o_ref.dtype)  # lane-dense (Np, Fp) f32 store


# ------------------------------ wrappers ----------------------------------- #
def _round_up(x, m):
    return ((x + m - 1) // m) * m


def gcn_sparse_forward(x, adj, params):
    """Eval-mode forward of GCN_sparse (dropout == identity), fully fused."""
    N, in_c = x.shape
    num_layers = len(params)
    out_c = params[-1][0].shape[0]

    # Lane-dense padded sizes: one shared feature width, padded node count.
    all_dims = [in_c] + [w.shape[0] for w, _ in params]
    fp = max(LANE, _round_up(max(all_dims), LANE))
    npad = max(LANE, _round_up(N, LANE))

    # Zero-pad and stack parameters: W^T -> (L, Fp, Fp) bf16, bias -> (L, 1, Fp) f32.
    w_t_pads, b_pads = [], []
    for (w, b) in params:
        fo, fi = w.shape
        w_t = jnp.transpose(w)                                    # (Fin, Fout)
        w_t_pads.append(jnp.pad(w_t, ((0, fp - fi), (0, fp - fo))))
        b_pads.append(jnp.pad(b, (0, fp - fo)).reshape(1, fp))
    w_stack = jnp.stack(w_t_pads).astype(jnp.bfloat16)            # (L, Fp, Fp)
    b_stack = jnp.stack(b_pads).astype(jnp.float32)               # (L, 1, Fp)

    # Zero-pad features (rows + cols) and adjacency (rows + cols).
    x_pad = jnp.zeros((npad, fp), jnp.bfloat16).at[:N, :in_c].set(
        x.astype(jnp.bfloat16))
    adj_pad = jnp.zeros((npad, npad), jnp.bfloat16).at[:N, :N].set(
        adj.astype(jnp.bfloat16))

    kernel = functools.partial(fused_gcn_kernel, num_layers=num_layers)
    out_pad = pl.pallas_call(
        kernel,
        out_shape=jax.ShapeDtypeStruct((npad, fp), jnp.float32),
        in_specs=[
            pl.BlockSpec((npad, npad), lambda: (0, 0)),             # adjacency (bf16)
            pl.BlockSpec((npad, fp), lambda: (0, 0)),               # padded features
            pl.BlockSpec((num_layers, fp, fp), lambda: (0, 0, 0)),  # stacked W^T
            pl.BlockSpec((num_layers, 1, fp), lambda: (0, 0, 0)),   # stacked bias
        ],
        out_specs=pl.BlockSpec((npad, fp), lambda: (0, 0)),
        compiler_params=pltpu.CompilerParams(vmem_limit_bytes=64 << 20),
    )(adj_pad, x_pad, w_stack, b_stack)

    return out_pad[:N, :out_c]


# ------------------------------ GCN_sparse --------------------------------- #
def init_linear(key, fan_in, fan_out):
    """Deterministic nn.Linear-style init: U(-1/sqrt(fan_in), 1/sqrt(fan_in))."""
    kw, kb = jax.random.split(key)
    bound = 1.0 / np.sqrt(fan_in)
    w = jax.random.uniform(kw, (fan_out, fan_in), jnp.float32, -bound, bound)
    b = jax.random.uniform(kb, (fan_out,), jnp.float32, -bound, bound)
    return w, b


def make_gcn_params(key, in_channels, hidden_channels, out_channels, num_layers):
    dims = [in_channels] + [hidden_channels] * (num_layers - 1) + [out_channels]
    params = []
    keys = jax.random.split(key, num_layers)
    for i in range(num_layers):
        w, b = init_linear(keys[i], dims[i], dims[i + 1])
        params.append((w, b))
    return params


# Pure-JAX f32 reference for correctness checking.
def gcn_sparse_ref(x, adj, params):
    n_layers = len(params)
    for i, (w, b) in enumerate(params):
        h = x @ w.T + b
        h = adj @ h
        if i != n_layers - 1:
            h = jnp.maximum(h, 0.0)
        x = h
    return x


# --------------------------------- main ------------------------------------ #
if __name__ == "__main__":
    key = jax.random.PRNGKey(0)
    k_x, k_adj_mask, k_adj_w, k_params = jax.random.split(key, 4)

    # Small synthetic problem: 64 nodes, 16 -> 32 -> 32 -> 8 channels (3 layers).
    N, IN_C, HID_C, OUT_C, NUM_LAYERS = 64, 16, 32, 8, 3

    x = jax.random.normal(k_x, (N, IN_C), jnp.float32)

    # Random sparse directed graph with edge weights, stored densely:
    # adj[v, u] = w_{u->v} if edge exists else 0.
    edge_mask = jax.random.bernoulli(k_adj_mask, p=0.1, shape=(N, N))
    edge_w = jax.random.uniform(k_adj_w, (N, N), jnp.float32, 0.1, 1.0)
    adj = jnp.where(edge_mask, edge_w, 0.0).astype(jnp.float32)

    params = make_gcn_params(k_params, IN_C, HID_C, OUT_C, NUM_LAYERS)

    out = gcn_sparse_forward(x, adj, params)
    out = jax.block_until_ready(out)

    ref = gcn_sparse_ref(x, adj, params)
    # bf16 MXU inputs with f32 accumulation -> loosened tolerance vs f32 ref.
    np.testing.assert_allclose(np.asarray(out), np.asarray(ref),
                               rtol=5e-2, atol=5e-2)

    print("KERNEL_OK")
</pallas_src>

<mosaic_0001>
module attributes {stable_mosaic.version = 11 : i64} {
  func.func @fused_gcn_kernel(%arg0: memref<128x128xbf16, #tpu.memory_space<vmem>>, %arg1: memref<128x128xbf16, #tpu.memory_space<vmem>>, %arg2: memref<3x128x128xbf16, #tpu.memory_space<vmem>>, %arg3: memref<3x1x128xf32, #tpu.memory_space<vmem>>, %arg4: memref<128x128xf32, #tpu.memory_space<vmem>>) attributes {dimension_semantics = [], scalar_prefetch = 0 : i64, scratch_operands = 0 : i64, tpu.core_type = #tpu.core_type<tc>} {
    %c0 = arith.constant 0 : index
    %c0_0 = arith.constant 0 : index
    %0 = vector.load %arg0[%c0, %c0_0] : memref<128x128xbf16, #tpu.memory_space<vmem>>, vector<128x128xbf16>
    %c0_1 = arith.constant 0 : index
    %c0_2 = arith.constant 0 : index
    %1 = vector.load %arg1[%c0_1, %c0_2] : memref<128x128xbf16, #tpu.memory_space<vmem>>, vector<128x128xbf16>
    %c0_3 = arith.constant 0 : index
    %c0_4 = arith.constant 0 : index
    %c0_5 = arith.constant 0 : index
    %2 = vector.load %arg2[%c0_3, %c0_4, %c0_5] : memref<3x128x128xbf16, #tpu.memory_space<vmem>>, vector<1x128x128xbf16>
    %3 = vector.shape_cast %2 : vector<1x128x128xbf16> to vector<128x128xbf16>
    %c0_6 = arith.constant 0 : index
    %c0_7 = arith.constant 0 : index
    %c0_8 = arith.constant 0 : index
    %4 = vector.load %arg3[%c0_6, %c0_7, %c0_8] : memref<3x1x128xf32, #tpu.memory_space<vmem>>, vector<1x1x128xf32>
    %5 = vector.shape_cast %4 : vector<1x1x128xf32> to vector<1x128xf32>
    %cst = arith.constant dense<0.000000e+00> : vector<128x128xf32>
    %6 = tpu.matmul %1, %3, %cst {dimension_numbers = #tpu.dot_dimension_numbers<[1], [0], [0], [1], [0, 0, 1, 1], [], []>} : vector<128x128xbf16>, vector<128x128xbf16>, vector<128x128xf32> -> vector<128x128xf32>
    %7 = vector.broadcast %5 : vector<1x128xf32> to vector<128x128xf32>
    %8 = arith.addf %6, %7 : vector<128x128xf32>
    %9 = arith.truncf %8 : vector<128x128xf32> to vector<128x128xbf16>
    %cst_9 = arith.constant dense<0.000000e+00> : vector<128x128xf32>
    %10 = tpu.matmul %0, %9, %cst_9 {dimension_numbers = #tpu.dot_dimension_numbers<[1], [0], [0], [1], [0, 0, 1, 1], [], []>} : vector<128x128xbf16>, vector<128x128xbf16>, vector<128x128xf32> -> vector<128x128xf32>
    %cst_10 = arith.constant 0.000000e+00 : f32
    %11 = vector.broadcast %cst_10 : f32 to vector<128x128xf32>
    %12 = arith.maximumf %10, %11 : vector<128x128xf32>
    %13 = arith.truncf %12 : vector<128x128xf32> to vector<128x128xbf16>
    %c1 = arith.constant 1 : index
    %c0_11 = arith.constant 0 : index
    %c0_12 = arith.constant 0 : index
    %14 = vector.load %arg2[%c1, %c0_11, %c0_12] : memref<3x128x128xbf16, #tpu.memory_space<vmem>>, vector<1x128x128xbf16>
    %15 = vector.shape_cast %14 : vector<1x128x128xbf16> to vector<128x128xbf16>
    %c1_13 = arith.constant 1 : index
    %c0_14 = arith.constant 0 : index
    %c0_15 = arith.constant 0 : index
    %16 = vector.load %arg3[%c1_13, %c0_14, %c0_15] : memref<3x1x128xf32, #tpu.memory_space<vmem>>, vector<1x1x128xf32>
    %17 = vector.shape_cast %16 : vector<1x1x128xf32> to vector<1x128xf32>
    %cst_16 = arith.constant dense<0.000000e+00> : vector<128x128xf32>
    %18 = tpu.matmul %13, %15, %cst_16 {dimension_numbers = #tpu.dot_dimension_numbers<[1], [0], [0], [1], [0, 0, 1, 1], [], []>} : vector<128x128xbf16>, vector<128x128xbf16>, vector<128x128xf32> -> vector<128x128xf32>
    %19 = vector.broadcast %17 : vector<1x128xf32> to vector<128x128xf32>
    %20 = arith.addf %18, %19 : vector<128x128xf32>
    %21 = arith.truncf %20 : vector<128x128xf32> to vector<128x128xbf16>
    %cst_17 = arith.constant dense<0.000000e+00> : vector<128x128xf32>
    %22 = tpu.matmul %0, %21, %cst_17 {dimension_numbers = #tpu.dot_dimension_numbers<[1], [0], [0], [1], [0, 0, 1, 1], [], []>} : vector<128x128xbf16>, vector<128x128xbf16>, vector<128x128xf32> -> vector<128x128xf32>
    %cst_18 = arith.constant 0.000000e+00 : f32
    %23 = vector.broadcast %cst_18 : f32 to vector<128x128xf32>
    %24 = arith.maximumf %22, %23 : vector<128x128xf32>
    %25 = arith.truncf %24 : vector<128x128xf32> to vector<128x128xbf16>
    %c2 = arith.constant 2 : index
    %c0_19 = arith.constant 0 : index
    %c0_20 = arith.constant 0 : index
    %26 = vector.load %arg2[%c2, %c0_19, %c0_20] : memref<3x128x128xbf16, #tpu.memory_space<vmem>>, vector<1x128x128xbf16>
    %27 = vector.shape_cast %26 : vector<1x128x128xbf16> to vector<128x128xbf16>
    %c2_21 = arith.constant 2 : index
    %c0_22 = arith.constant 0 : index
    %c0_23 = arith.constant 0 : index
    %28 = vector.load %arg3[%c2_21, %c0_22, %c0_23] : memref<3x1x128xf32, #tpu.memory_space<vmem>>, vector<1x1x128xf32>
    %29 = vector.shape_cast %28 : vector<1x1x128xf32> to vector<1x128xf32>
    %cst_24 = arith.constant dense<0.000000e+00> : vector<128x128xf32>
    %30 = tpu.matmul %25, %27, %cst_24 {dimension_numbers = #tpu.dot_dimension_numbers<[1], [0], [0], [1], [0, 0, 1, 1], [], []>} : vector<128x128xbf16>, vector<128x128xbf16>, vector<128x128xf32> -> vector<128x128xf32>
    %31 = vector.broadcast %29 : vector<1x128xf32> to vector<128x128xf32>
    %32 = arith.addf %30, %31 : vector<128x128xf32>
    %33 = arith.truncf %32 : vector<128x128xf32> to vector<128x128xbf16>
    %cst_25 = arith.constant dense<0.000000e+00> : vector<128x128xf32>
    %34 = tpu.matmul %0, %33, %cst_25 {dimension_numbers = #tpu.dot_dimension_numbers<[1], [0], [0], [1], [0, 0, 1, 1], [], []>} : vector<128x128xbf16>, vector<128x128xbf16>, vector<128x128xf32> -> vector<128x128xf32>
    %c0_26 = arith.constant 0 : index
    %c0_27 = arith.constant 0 : index
    %35 = vector.load %arg4[%c0_26, %c0_27] : memref<128x128xf32, #tpu.memory_space<vmem>>, vector<128x128xf32>
    tpu.vector_store %arg4[%c0_26, %c0_27], %34 {strides = array<i32>} : memref<128x128xf32, #tpu.memory_space<vmem>>, vector<128x128xf32>,
    return
  }
}

</mosaic_0001>

<bundles_post_ra>
// kernel: tpu_custom_call.1
= control target key start
LH: loop header
LB: loop body
LE: loop exit
PB: predicated region body
PF: predicated region fallthrough
CT: control target
= control target key end

     0   :  { %9 = vsyncpa [#allocation3], 0  ;;  %s1768_s0 = inlined_call_operand.hbm [shape: bf16[128,128], index: 0, kind: input, shape index: {}]   ;;  %s1769_s1 = inlined_call_operand.hbm [shape: bf16[128,128], index: 1, kind: input, shape index: {}]   ;;  %s1770_s2 = inlined_call_operand.hbm [shape: bf16[3,128,128], index: 2, kind: input, shape index: {}]   ;;  %s1771_s3 = inlined_call_operand.hbm [shape: f32[3,1,128], index: 3, kind: input, shape index: {}]   ;;  %s1772_s4 = inlined_call_operand.hbm [shape: f32[128,128], index: 4, kind: output, shape index: {}]  }
   0x1   :  { %10 = vsyncpa [#allocation6], 0 }
   0x2   :  { %11 = vsyncpa [#allocation9], 0 }
   0x3   :  { %12 = vsyncpa [#allocation4], 0  ;;  %s1608_s15 = smov [#allocation5]   ;;  %s1609_s17 = smov [#allocation2]  }
   0x4   :  { %s30_s16 = sshll.u32 %s1608_s15, 4  ;;  %s18_s18 = sshll.u32 %s1609_s17, 4  ;;  %s31_s16 = int_to_ptr.vmem [resolvable:$true] %s30_s16  ;;  %s1644_s18 = int_to_ptr.vmem [resolvable:$true] %s18_s18 }
   0x5   :  { %s1490_s21 = scalar_lea.hbm %s1769_s1, 1024 }
   0x6   :  { %p1491_p0 = scmp.ne.s32.totalorder %s1769_s1, %s1490_s21  ;;  %p1494_p1 = scmp.lt.u32.totalorder %s1490_s21, %s1769_s1 }
   0x8   :  { %p1496_p2 = pnand %p1494_p1, %p1491_p0 }
   0xa   :  { %1499 = shalt.err (!%p1496_p2)
}
   0xb   :  { %s1500_s26 = scalar_lea.vmem %s31_s16, 1024  ;;  %p1505_p4 = scmp.lt.s32.totalorder %s31_s16, %s31_s16 }
   0xc   :  { %p1501_p3 = scmp.ne.s32.totalorder %s31_s16, %s1500_s26  ;;  %p1506_p5 = scmp.lt.s32.totalorder %s1500_s26, %s1500_s26 }
   0xe   :  { %p1507_p6 = por %p1506_p5, %p1505_p4 }
  0x10   :  { %p1508_p7 = pnand %p1507_p6, %p1501_p3 }
  0x12   :  { %1511 = shalt.err (!%p1508_p7)
}
  0x13   :  { %s1610_s27 = smov 64   ;;  %s1611_s28 = smov 4  }
  0x14   :  { %36 = dma.hbm_to_vmem [thread:$0]  %s1769_s1, 1024, %s31_s16, [#allocation6], %s1610_s27, %s1610_s27, %s1611_s28  }
  0x15   :  { %s1512_s7 = scalar_lea.hbm %s1768_s0, 1024 }
  0x16   :  { %p1513_p8 = scmp.ne.s32.totalorder %s1768_s0, %s1512_s7  ;;  %p1516_p9 = scmp.lt.u32.totalorder %s1512_s7, %s1768_s0 }
  0x18   :  { %p1518_p10 = pnand %p1516_p9, %p1513_p8 }
  0x1a   :  { %1521 = shalt.err (!%p1518_p10)
}
  0x1b   :  { %s1522_s12 = scalar_lea.vmem %s1644_s18, 1024  ;;  %p1527_p12 = scmp.lt.s32.totalorder %s1644_s18, %s1644_s18 }
  0x1c   :  { %p1523_p11 = scmp.ne.s32.totalorder %s1644_s18, %s1522_s12  ;;  %p1528_p13 = scmp.lt.s32.totalorder %s1522_s12, %s1522_s12 }
  0x1e   :  { %p1529_p0 = por %p1528_p13, %p1527_p12 }
  0x20   :  { %p1530_p1 = pnand %p1529_p0, %p1523_p11 }
  0x22   :  { %1533 = shalt.err (!%p1530_p1)
}
  0x23   :  { %24 = dma.hbm_to_vmem [thread:$0]  %s1768_s0, 1024, %s1644_s18, [#allocation3], %s1610_s27, %s1610_s27, %s1611_s28  }
  0x24   :  { %s1612_s14 = smov [#allocation7]   ;;  %s1613_s16 = smov [#allocation8]  }
  0x25   :  { %s42_s15 = sshll.u32 %s1612_s14, 4  ;;  %s54_s17 = sshll.u32 %s1613_s16, 4  ;;  %s43_s15 = int_to_ptr.vmem [resolvable:$true] %s42_s15  ;;  %s1681_s17 = int_to_ptr.vmem [resolvable:$true] %s54_s17 }
  0x26   :  { %s1534_s21 = scalar_lea.hbm %s1770_s2, 3072 }
  0x27   :  { %p1535_p2 = scmp.ne.s32.totalorder %s1770_s2, %s1534_s21  ;;  %p1538_p3 = scmp.lt.u32.totalorder %s1534_s21, %s1770_s2 }
  0x29   :  { %p1540_p4 = pnand %p1538_p3, %p1535_p2 }
  0x2b   :  { %1543 = shalt.err (!%p1540_p4)
}
  0x2c   :  { %s1544_s0 = scalar_lea.vmem %s43_s15, 3072  ;;  %p1549_p6 = scmp.lt.s32.totalorder %s43_s15, %s43_s15 }
  0x2d   :  { %p1545_p5 = scmp.ne.s32.totalorder %s43_s15, %s1544_s0  ;;  %p1550_p7 = scmp.lt.s32.totalorder %s1544_s0, %s1544_s0 }
  0x2f   :  { %p1551_p8 = por %p1550_p7, %p1549_p6 }
  0x31   :  { %p1552_p9 = pnand %p1551_p8, %p1545_p5 }
  0x33   :  { %1555 = shalt.err (!%p1552_p9)
}
  0x34   :  { %48 = dma.hbm_to_vmem [thread:$0]  %s1770_s2, 3072, %s43_s15, [#allocation6], %s1610_s27, %s1610_s27, %s1611_s28  }
  0x35   :  { %s1556_s5 = scalar_lea.hbm %s1771_s3, 48 }
  0x36   :  { %p1557_p10 = scmp.ne.s32.totalorder %s1771_s3, %s1556_s5  ;;  %p1560_p11 = scmp.lt.u32.totalorder %s1556_s5, %s1771_s3 }
  0x38   :  { %p1562_p12 = pnand %p1560_p11, %p1557_p10 }
  0x3a   :  { %1565 = shalt.err (!%p1562_p12)
}
  0x3b   :  { %s1566_s10 = scalar_lea.vmem %s1681_s17, 48  ;;  %s1570_s2 = scalar_lea.vmem %s1681_s17, 64 }
  0x3c   :  { %p1567_p13 = scmp.ne.s32.totalorder %s1681_s17, %s1566_s10  ;;  %p1571_p0 = scmp.lt.s32.totalorder %s1681_s17, %s1681_s17 }
  0x3d   :  { %p1572_p1 = scmp.lt.s32.totalorder %s1570_s2, %s1566_s10 }
  0x3f   :  { %p1573_p2 = por %p1572_p1, %p1571_p0 }
  0x41   :  { %p1574_p3 = pnand %p1573_p2, %p1567_p13 }
  0x43   :  { %1577 = shalt.err (!%p1574_p3)
}
  0x44   :  { %s1614_s27 = smov 16   ;;  %s1615_s28 = smov 1  }
  0x45   :  { %60 = dma.hbm_to_vmem [thread:$0]  %s1771_s3, 48, %s1681_s17, [#allocation9], %s1614_s27, %s1614_s27, %s1615_s28  }
  0x46   :  { %1600 = dma.done.wait [#allocation3], 1024  }
  0x47   :  { %1601 = vsyncadd [#allocation3], 4294966272 }
  0x48   :  { %1602 = dma.done.wait [#allocation6], 4096  }
  0x49   :  { %1603 = vsyncadd [#allocation6], 4294963200 }
  0x4a   :  { %1604 = dma.done.wait [#allocation9], 48  }
  0x4b   :  { %1605 = vsyncadd [#allocation9], 4294967248  ;;  %v1450_v0 = vld [vmem:[#allocation7] sm:$0xff]   ;;  %v1451_v1 = vld [vmem:[#allocation7 + $0x8] sm:$0xff]   ;;  %s1616_s3 = smov [#allocation10]  }
  0x4c   :  { %1247 = vmatprep.subr.bf16.mxu0 %v1450_v0  ;;  %v1452_v2 = vld [vmem:[#allocation7 + $0x10] sm:$0xff]   ;;  %v1453_v3 = vld [vmem:[#allocation7 + $0x18] sm:$0xff]   ;;  %v1458_v4 = vld [vmem:[#allocation5] sm:$0xff]   ;;  %s1094_s1 = sshll.u32 %s1616_s3, 4  ;;  %s1095_s1 = int_to_ptr.vmem [resolvable:$true] %s1094_s1 }
  0x4d   :  { %1248 = vmatpush3.bf16.msra.mxu0 %v1450_v0  ;;  %1263 = vmatprep.mubr.bf16.mxu0 %v1458_v4  ;;  %v1454_v5 = vld [vmem:[#allocation7 + $0x20] sm:$0xff]   ;;  %v1455_v6 = vld [vmem:[#allocation7 + $0x28] sm:$0xff]   ;;  %v1456_v7 = vld [vmem:[#allocation7 + $0x30] sm:$0xff]   ;;  %s1578_s13 = scalar_lea.vmem %s1095_s1, 2048  ;;  %p1583_p5 = scmp.lt.s32.totalorder %s1095_s1, %s1095_s1 }
  0x4e   :  { %1249 = vmatprep.subr.bf16.mxu0 %v1451_v1  ;;  %v1457_v8 = vld [vmem:[#allocation7 + $0x38] sm:$0xff]   ;;  %v1459_v9 = vld [vmem:[#allocation5 + $0x8] sm:$0xff]   ;;  %v1460_v10 = vld [vmem:[#allocation5 + $0x10] sm:$0xff]   ;;  %p1579_p4 = scmp.ne.s32.totalorder %s1095_s1, %s1578_s13  ;;  %p1584_p6 = scmp.lt.s32.totalorder %s1578_s13, %s1578_s13 }
  0x4f   :  { %v1461_v11 = vld [vmem:[#allocation5 + $0x18] sm:$0xff]   ;;  %v1462_v12 = vld [vmem:[#allocation5 + $0x20] sm:$0xff]   ;;  %v1463_v13 = vld [vmem:[#allocation5 + $0x28] sm:$0xff]  }
  0x50   :  { %v1464_v14 = vld [vmem:[#allocation5 + $0x30] sm:$0xff]   ;;  %v1465_v15 = vld [vmem:[#allocation5 + $0x38] sm:$0xff]   ;;  %v1716_v16 = vld [vmem:[#allocation2] sm:$0xff]   ;;  %p1585_p7 = por %p1584_p6, %p1583_p5 }
  0x51   :  { %1250 = vmatpush3.bf16.msra.mxu0 %v1451_v1  ;;  %1295 = vmatprep.mubr.bf16.mxu1 %v1716_v16  ;;  %v1474_v17 = vld [vmem:[#allocation7 + $0x40] sm:$0xff]   ;;  %v1475_v18 = vld [vmem:[#allocation7 + $0x48] sm:$0xff]   ;;  %v1476_v19 = vld [vmem:[#allocation7 + $0x50] sm:$0xff]  }
  0x52   :  { %1251 = vmatprep.subr.bf16.mxu0 %v1452_v2  ;;  %v1477_v20 = vld [vmem:[#allocation7 + $0x58] sm:$0xff]   ;;  %v1478_v21 = vld [vmem:[#allocation7 + $0x60] sm:$0xff]   ;;  %v1479_v22 = vld [vmem:[#allocation7 + $0x68] sm:$0xff]   ;;  %p1586_p8 = pnand %p1585_p7, %p1579_p4 }
  0x53   :  { %v1108_v24 = vld [vmem:[#allocation8] ss:$0 sm:$0xff]  ;;  %v1719_v0 = vld [vmem:[#allocation2 + $0x8] sm:$0xff]   ;;  %v1721_v1 = vld [vmem:[#allocation2 + $0x10] sm:$0xff]  }
  0x54   :  { %v1731_v4 = vld [vmem:[#allocation2 + $0x28] sm:$0xff]  }
  0x55   :  { %1252 = vmatpush3.bf16.msra.mxu0 %v1452_v2  ;;  %v1725_v2 = vld [vmem:[#allocation2 + $0x18] sm:$0xff]  }
  0x56   :  { %1253 = vmatprep.subr.bf16.mxu0 %v1453_v3 }
  0x59   :  { %1254 = vmatpush3.bf16.msra.mxu0 %v1453_v3  ;;  %v1727_v3 = vld [vmem:[#allocation2 + $0x20] sm:$0xff]  }
  0x5a   :  { %1255 = vmatprep.subr.bf16.mxu0 %v1454_v5 }
  0x5d   :  { %1256 = vmatpush3.bf16.msra.mxu0 %v1454_v5  ;;  %v1733_v5 = vld [vmem:[#allocation2 + $0x30] sm:$0xff]  }
  0x5e   :  { %1257 = vmatprep.subr.bf16.mxu0 %v1455_v6 }
  0x61   :  { %1258 = vmatpush3.bf16.msra.mxu0 %v1455_v6  ;;  %v1737_v6 = vld [vmem:[#allocation2 + $0x38] sm:$0xff]  }
  0x62   :  { %1259 = vmatprep.subr.bf16.mxu0 %v1456_v7 }
  0x65   :  { %1260 = vmatpush3.bf16.msra.mxu0 %v1456_v7  ;;  %v1480_v7 = vld [vmem:[#allocation7 + $0x70] sm:$0xff]  }
  0x66   :  { %1261 = vmatprep.subr.bf16.mxu0 %v1457_v8 }
  0x69   :  { %1262 = vmatpush3.bf16.msra.mxu0 %v1457_v8  ;;  %v1481_v8 = vld [vmem:[#allocation7 + $0x78] sm:$0xff]  }
  0x6a   :  { %1311 = vmatprep.subr.bf16.mxu0 %v1474_v17 }
  0x6c   :  { %1264 = vmatmul.mubr.bf16.vlgmr.msra.gmra.mrb[0].mxu0 %v1459_v9 }
  0x6d   :  { %1267 = vmatprep.mubr.bf16.mxu0 %v1460_v10  ;;  %1312 = vmatpush3.bf16.msra.mxu0 %v1474_v17 }
  0x6e   :  { %1313 = vmatprep.subr.bf16.mxu0 %v1475_v18 }
  0x71   :  { %1314 = vmatpush3.bf16.msra.mxu0 %v1475_v18 }
  0x72   :  { %1315 = vmatprep.subr.bf16.mxu0 %v1476_v19 }
  0x74   :  { %1268 = vmatmul.mubr.bf16.gmra.mrb[4].mxu0 %v1461_v11 }
  0x75   :  { %1271 = vmatprep.mubr.bf16.mxu0 %v1462_v12  ;;  %1316 = vmatpush3.bf16.msra.mxu0 %v1476_v19 }
  0x76   :  { %1317 = vmatprep.subr.bf16.mxu0 %v1477_v20 }
  0x79   :  { %1318 = vmatpush3.bf16.msra.mxu0 %v1477_v20 }
  0x7a   :  { %1319 = vmatprep.subr.bf16.mxu0 %v1478_v21 }
  0x7c   :  { %1272 = vmatmul.mubr.bf16.gmra.mrb[8].mxu0 %v1463_v13 }
  0x7d   :  { %1275 = vmatprep.mubr.bf16.mxu0 %v1464_v14  ;;  %1320 = vmatpush3.bf16.msra.mxu0 %v1478_v21 }
  0x7e   :  { %1321 = vmatprep.subr.bf16.mxu0 %v1479_v22 }
  0x81   :  { %1322 = vmatpush3.bf16.msra.mxu0 %v1479_v22 }
  0x82   :  { %1323 = vmatprep.subr.bf16.mxu0 %v1480_v7 }
  0x84   :  { %1276 = vmatmul.mubr.bf16.gmra.mrb[12].mxu0 %v1465_v15 }
  0x85   :  { %1324 = vmatpush3.bf16.msra.mxu0 %v1480_v7 }
  0x86   :  { %1325 = vmatprep.subr.bf16.mxu0 %v1481_v8 }
  0x89   :  { %1326 = vmatpush3.bf16.msra.mxu0 %v1481_v8 }
 0x13f   :  { %v1265_v23 = vpop.f32.mrb[0].mxu0 }
 0x140   :  { %v259_v25 = vpop.f32.mrb[1].mxu0  ;;  %v268_v27 = vadd.f32 %v1265_v23, %v1108_v24 }
 0x141   :  { %v1266_v26 = vpop.f32.mrb[2].mxu0  ;;  %v260_v30 = vadd.f32 %v1108_v24, %v259_v25 }
 0x142   :  { %v271_v28 = vadd.f32 %v1266_v26, %v1108_v24  ;;  %v262_v29 = vpop.f32.mrb[3].mxu0 }
 0x143   :  { %v263_v31 = vadd.f32 %v1108_v24, %v262_v29 }
 0x144   :  { %v323_v32 = vpack.c.bf16 %v271_v28, %v268_v27 }
 0x145   :  { %v322_v33 = vpack.c.bf16 %v263_v31, %v260_v30 }
 0x147   :  { %v1269_v34 = vpop.f32.mrb[4].mxu0  ;;  %1279 = vmatprep.subr.bf16.mxu1 %v322_v33 }
 0x148   :  { %v275_v35 = vpop.f32.mrb[5].mxu0  ;;  %1280 = vmatpush3.bf16.msra.mxu1 %v322_v33  ;;  %v284_v37 = vadd.f32 %v1269_v34, %v1108_v24 }
 0x149   :  { %v1270_v36 = vpop.f32.mrb[6].mxu0  ;;  %1281 = vmatprep.subr.bf16.mxu1 %v323_v32  ;;  %v276_v40 = vadd.f32 %v1108_v24, %v275_v35 }
 0x14a   :  { %v287_v38 = vadd.f32 %v1270_v36, %v1108_v24  ;;  %v278_v39 = vpop.f32.mrb[7].mxu0 }
 0x14b   :  { %v279_v41 = vadd.f32 %v1108_v24, %v278_v39 }
 0x14c   :  { %v325_v42 = vpack.c.bf16 %v287_v38, %v284_v37  ;;  %1282 = vmatpush3.bf16.msra.mxu1 %v323_v32 }
 0x14d   :  { %v324_v43 = vpack.c.bf16 %v279_v41, %v276_v40 }
 0x14f   :  { %v1273_v44 = vpop.f32.mrb[8].mxu0  ;;  %1283 = vmatprep.subr.bf16.mxu1 %v324_v43 }
 0x150   :  { %v291_v45 = vpop.f32.mrb[9].mxu0  ;;  %1284 = vmatpush3.bf16.msra.mxu1 %v324_v43  ;;  %v300_v47 = vadd.f32 %v1273_v44, %v1108_v24 }
 0x151   :  { %v1274_v46 = vpop.f32.mrb[10].mxu0  ;;  %1285 = vmatprep.subr.bf16.mxu1 %v325_v42  ;;  %v292_v50 = vadd.f32 %v1108_v24, %v291_v45 }
 0x152   :  { %v303_v48 = vadd.f32 %v1274_v46, %v1108_v24  ;;  %v294_v49 = vpop.f32.mrb[11].mxu0 }
 0x153   :  { %v295_v51 = vadd.f32 %v1108_v24, %v294_v49 }
 0x154   :  { %v327_v52 = vpack.c.bf16 %v303_v48, %v300_v47  ;;  %1286 = vmatpush3.bf16.msra.mxu1 %v325_v42 }
 0x155   :  { %v326_v53 = vpack.c.bf16 %v295_v51, %v292_v50  ;;  %v1482_v50 = vld [vmem:[#allocation7 + $0x80] sm:$0xff]   ;;  %v1483_v51 = vld [vmem:[#allocation7 + $0x88] sm:$0xff]  }
 0x156   :  { %1375 = vmatprep.subr.bf16.mxu0 %v1482_v50 }
 0x157   :  { %v1277_v54 = vpop.f32.mrb[12].mxu0  ;;  %1287 = vmatprep.subr.bf16.mxu1 %v326_v53 }
 0x158   :  { %v307_v55 = vpop.f32.mrb[13].mxu0  ;;  %1288 = vmatpush3.bf16.msra.mxu1 %v326_v53  ;;  %v316_v57 = vadd.f32 %v1277_v54, %v1108_v24  ;;  %v1485_v53 = vld [vmem:[#allocation7 + $0x98] sm:$0xff]   ;;  %v1486_v54 = vld [vmem:[#allocation7 + $0xa0] sm:$0xff]  }
 0x159   :  { %v1278_v56 = vpop.f32.mrb[14].mxu0  ;;  %1289 = vmatprep.subr.bf16.mxu1 %v327_v52  ;;  %v308_v60 = vadd.f32 %v1108_v24, %v307_v55  ;;  %v1487_v55 = vld [vmem:[#allocation7 + $0xa8] sm:$0xff]  }
 0x15a   :  { %v319_v58 = vadd.f32 %v1278_v56, %v1108_v24  ;;  %v310_v59 = vpop.f32.mrb[15].mxu0 }
 0x15b   :  { %v311_v61 = vadd.f32 %v1108_v24, %v310_v59 }
 0x15c   :  { %v329_v62 = vpack.c.bf16 %v319_v58, %v316_v57  ;;  %1290 = vmatpush3.bf16.msra.mxu1 %v327_v52  ;;  %v1484_v52 = vld [vmem:[#allocation7 + $0x90] sm:$0xff]   ;;  %v1133_v57 = vld [vmem:[#allocation8 + $0x1] ss:$0 sm:$0xff] }
 0x15d   :  { %v328_v63 = vpack.c.bf16 %v311_v61, %v308_v60 }
 0x15f   :  { %1291 = vmatprep.subr.bf16.mxu1 %v328_v63 }
 0x160   :  { %1292 = vmatpush3.bf16.msra.mxu1 %v328_v63 }
 0x161   :  { %1293 = vmatprep.subr.bf16.mxu1 %v329_v62 }
 0x164   :  { %1294 = vmatpush3.bf16.msra.mxu1 %v329_v62 }
 0x167   :  { %1296 = vmatmul.mubr.bf16.vlgmr.msra.gmra.mrb[0].mxu1 %v1719_v0 }
 0x168   :  { %1299 = vmatprep.mubr.bf16.mxu1 %v1721_v1 }
 0x16f   :  { %1300 = vmatmul.mubr.bf16.gmra.mrb[4].mxu1 %v1725_v2 }
 0x170   :  { %1303 = vmatprep.mubr.bf16.mxu1 %v1727_v3 }
 0x177   :  { %1304 = vmatmul.mubr.bf16.gmra.mrb[8].mxu1 %v1731_v4 }
 0x178   :  { %1307 = vmatprep.mubr.bf16.mxu1 %v1733_v5 }
 0x17f   :  { %1308 = vmatmul.mubr.bf16.gmra.mrb[12].mxu1 %v1737_v6 }
 0x180   :  { %1359 = vmatprep.mubr.bf16.mxu1 %v1716_v16 }
 0x23a   :  { %v1297_v9 = vpop.f32.mrb[0].mxu1 }
 0x23b   :  { %v412_v10 = vpop.f32.mrb[1].mxu1  ;;  %v477_v12 = vmax.f32 %v1297_v9, 0.0 }
 0x23c   :  { %v1298_v11 = vpop.f32.mrb[2].mxu1  ;;  %v475_v15 = vmax.f32 %v412_v10, 0.0 }
 0x23d   :  { %v478_v13 = vmax.f32 %v1298_v11, 0.0  ;;  %v415_v14 = vpop.f32.mrb[3].mxu1 }
 0x23e   :  { %v476_v17 = vmax.f32 %v415_v14, 0.0 }
 0x23f   :  { %v492_v18 = vpack.c.bf16 %v478_v13, %v477_v12 }
 0x240   :  { %v491_v19 = vpack.c.bf16 %v476_v17, %v475_v15 }
 0x242   :  { %v1301_v20 = vpop.f32.mrb[4].mxu1  ;;  %1327 = vmatprep.mubr.bf16.mxu0 %v491_v19 }
 0x243   :  { %v428_v21 = vpop.f32.mrb[5].mxu1  ;;  %1328 = vmatmul.mubr.bf16.vlgmr.msra.gmra.mrb[16].mxu0 %v492_v18  ;;  %v481_v23 = vmax.f32 %v1301_v20, 0.0 }
 0x244   :  { %v1302_v22 = vpop.f32.mrb[6].mxu1  ;;  %v479_v26 = vmax.f32 %v428_v21, 0.0  ;;  %1376 = vmatpush3.bf16.msra.mxu0 %v1482_v50 }
 0x245   :  { %v482_v24 = vmax.f32 %v1302_v22, 0.0  ;;  %v431_v25 = vpop.f32.mrb[7].mxu1  ;;  %1377 = vmatprep.subr.bf16.mxu0 %v1483_v51 }
 0x246   :  { %v480_v27 = vmax.f32 %v431_v25, 0.0 }
 0x247   :  { %v494_v28 = vpack.c.bf16 %v482_v24, %v481_v23 }
 0x248   :  { %v493_v29 = vpack.c.bf16 %v480_v27, %v479_v26  ;;  %1378 = vmatpush3.bf16.msra.mxu0 %v1483_v51 }
 0x249   :  { %1379 = vmatprep.subr.bf16.mxu0 %v1484_v52 }
 0x24a   :  { %v1305_v30 = vpop.f32.mrb[8].mxu1  ;;  %1331 = vmatprep.mubr.bf16.mxu0 %v493_v29 }
 0x24b   :  { %v444_v31 = vpop.f32.mrb[9].mxu1  ;;  %1332 = vmatmul.mubr.bf16.gmra.mrb[20].mxu0 %v494_v28  ;;  %v485_v33 = vmax.f32 %v1305_v30, 0.0 }
 0x24c   :  { %v1306_v32 = vpop.f32.mrb[10].mxu1  ;;  %v483_v36 = vmax.f32 %v444_v31, 0.0  ;;  %1380 = vmatpush3.bf16.msra.mxu0 %v1484_v52 }
 0x24d   :  { %v486_v34 = vmax.f32 %v1306_v32, 0.0  ;;  %v447_v35 = vpop.f32.mrb[11].mxu1  ;;  %1381 = vmatprep.subr.bf16.mxu0 %v1485_v53 }
 0x24e   :  { %v484_v37 = vmax.f32 %v447_v35, 0.0 }
 0x24f   :  { %v496_v38 = vpack.c.bf16 %v486_v34, %v485_v33 }
 0x250   :  { %v495_v39 = vpack.c.bf16 %v484_v37, %v483_v36  ;;  %1382 = vmatpush3.bf16.msra.mxu0 %v1485_v53 }
 0x251   :  { %1383 = vmatprep.subr.bf16.mxu0 %v1486_v54 }
 0x252   :  { %v1309_v40 = vpop.f32.mrb[12].mxu1  ;;  %1335 = vmatprep.mubr.bf16.mxu0 %v495_v39 }
 0x253   :  { %v460_v41 = vpop.f32.mrb[13].mxu1  ;;  %1336 = vmatmul.mubr.bf16.gmra.mrb[24].mxu0 %v496_v38  ;;  %v489_v43 = vmax.f32 %v1309_v40, 0.0 }
 0x254   :  { %v1310_v42 = vpop.f32.mrb[14].mxu1  ;;  %v487_v46 = vmax.f32 %v460_v41, 0.0  ;;  %1384 = vmatpush3.bf16.msra.mxu0 %v1486_v54  ;;  %v1488_v41 = vld [vmem:[#allocation7 + $0xb0] sm:$0xff]  }
 0x255   :  { %v490_v44 = vmax.f32 %v1310_v42, 0.0  ;;  %v463_v45 = vpop.f32.mrb[15].mxu1  ;;  %1385 = vmatprep.subr.bf16.mxu0 %v1487_v55  ;;  %v1489_v42 = vld [vmem:[#allocation7 + $0xb8] sm:$0xff]  }
 0x256   :  { %v488_v47 = vmax.f32 %v463_v45, 0.0 }
 0x257   :  { %v498_v48 = vpack.c.bf16 %v490_v44, %v489_v43 }
 0x258   :  { %v497_v49 = vpack.c.bf16 %v488_v47, %v487_v46  ;;  %1386 = vmatpush3.bf16.msra.mxu0 %v1487_v55 }
 0x259   :  { %1387 = vmatprep.subr.bf16.mxu0 %v1488_v41 }
 0x25a   :  { %1339 = vmatprep.mubr.bf16.mxu0 %v497_v49 }
 0x25b   :  { %1340 = vmatmul.mubr.bf16.gmra.mrb[28].mxu0 %v498_v48 }
 0x25c   :  { %1388 = vmatpush3.bf16.msra.mxu0 %v1488_v41 }
 0x25d   :  { %1389 = vmatprep.subr.bf16.mxu0 %v1489_v42 }
 0x260   :  { %1390 = vmatpush3.bf16.msra.mxu0 %v1489_v42 }
 0x316   :  { %v1329_v56 = vpop.f32.mrb[16].mxu0 }
 0x317   :  { %v606_v58 = vpop.f32.mrb[17].mxu0  ;;  %v615_v60 = vadd.f32 %v1329_v56, %v1133_v57 }
 0x318   :  { %v1330_v59 = vpop.f32.mrb[18].mxu0  ;;  %v607_v63 = vadd.f32 %v1133_v57, %v606_v58 }
 0x319   :  { %v618_v61 = vadd.f32 %v1330_v59, %v1133_v57  ;;  %v609_v62 = vpop.f32.mrb[19].mxu0 }
 0x31a   :  { %v610_v7 = vadd.f32 %v1133_v57, %v609_v62 }
 0x31b   :  { %v670_v8 = vpack.c.bf16 %v618_v61, %v615_v60 }
 0x31c   :  { %v669_v9 = vpack.c.bf16 %v610_v7, %v607_v63 }
 0x31e   :  { %v1333_v10 = vpop.f32.mrb[20].mxu0  ;;  %1343 = vmatprep.subr.bf16.mxu1 %v669_v9 }
 0x31f   :  { %v622_v11 = vpop.f32.mrb[21].mxu0  ;;  %1344 = vmatpush3.bf16.msra.mxu1 %v669_v9  ;;  %v631_v13 = vadd.f32 %v1333_v10, %v1133_v57 }
 0x320   :  { %v1334_v12 = vpop.f32.mrb[22].mxu0  ;;  %1345 = vmatprep.subr.bf16.mxu1 %v670_v8  ;;  %v623_v17 = vadd.f32 %v1133_v57, %v622_v11 }
 0x321   :  { %v634_v14 = vadd.f32 %v1334_v12, %v1133_v57  ;;  %v625_v15 = vpop.f32.mrb[23].mxu0 }
 0x322   :  { %v626_v18 = vadd.f32 %v1133_v57, %v625_v15 }
 0x323   :  { %v672_v19 = vpack.c.bf16 %v634_v14, %v631_v13  ;;  %1346 = vmatpush3.bf16.msra.mxu1 %v670_v8 }
 0x324   :  { %v671_v20 = vpack.c.bf16 %v626_v18, %v623_v17 }
 0x326   :  { %v1337_v21 = vpop.f32.mrb[24].mxu0  ;;  %1347 = vmatprep.subr.bf16.mxu1 %v671_v20 }
 0x327   :  { %v638_v22 = vpop.f32.mrb[25].mxu0  ;;  %1348 = vmatpush3.bf16.msra.mxu1 %v671_v20  ;;  %v647_v24 = vadd.f32 %v1337_v21, %v1133_v57 }
 0x328   :  { %v1338_v23 = vpop.f32.mrb[26].mxu0  ;;  %1349 = vmatprep.subr.bf16.mxu1 %v672_v19  ;;  %v639_v27 = vadd.f32 %v1133_v57, %v638_v22 }
 0x329   :  { %v650_v25 = vadd.f32 %v1338_v23, %v1133_v57  ;;  %v641_v26 = vpop.f32.mrb[27].mxu0 }
 0x32a   :  { %v642_v28 = vadd.f32 %v1133_v57, %v641_v26 }
 0x32b   :  { %v674_v29 = vpack.c.bf16 %v650_v25, %v647_v24  ;;  %1350 = vmatpush3.bf16.msra.mxu1 %v672_v19 }
 0x32c   :  { %v673_v30 = vpack.c.bf16 %v642_v28, %v639_v27  ;;  %v1142_v27 = vld [vmem:[#allocation8 + $0x2] ss:$0 sm:$0xff] }
 0x32e   :  { %v1341_v31 = vpop.f32.mrb[28].mxu0  ;;  %1351 = vmatprep.subr.bf16.mxu1 %v673_v30 }
 0x32f   :  { %v654_v32 = vpop.f32.mrb[29].mxu0  ;;  %1352 = vmatpush3.bf16.msra.mxu1 %v673_v30  ;;  %v663_v34 = vadd.f32 %v1341_v31, %v1133_v57 }
 0x330   :  { %v1342_v33 = vpop.f32.mrb[30].mxu0  ;;  %1353 = vmatprep.subr.bf16.mxu1 %v674_v29  ;;  %v655_v37 = vadd.f32 %v1133_v57, %v654_v32 }
 0x331   :  { %v666_v35 = vadd.f32 %v1342_v33, %v1133_v57  ;;  %v657_v36 = vpop.f32.mrb[31].mxu0 }
 0x332   :  { %v658_v38 = vadd.f32 %v1133_v57, %v657_v36 }
 0x333   :  { %v676_v39 = vpack.c.bf16 %v666_v35, %v663_v34  ;;  %1354 = vmatpush3.bf16.msra.mxu1 %v674_v29 }
 0x334   :  { %v675_v40 = vpack.c.bf16 %v658_v38, %v655_v37 }
 0x336   :  { %1355 = vmatprep.subr.bf16.mxu1 %v675_v40 }
 0x337   :  { %1356 = vmatpush3.bf16.msra.mxu1 %v675_v40 }
 0x338   :  { %1357 = vmatprep.subr.bf16.mxu1 %v676_v39 }
 0x33b   :  { %1358 = vmatpush3.bf16.msra.mxu1 %v676_v39 }
 0x33e   :  { %1360 = vmatmul.mubr.bf16.vlgmr.msra.gmra.mrb[16].mxu1 %v1719_v0 }
 0x33f   :  { %1363 = vmatprep.mubr.bf16.mxu1 %v1721_v1 }
 0x346   :  { %1364 = vmatmul.mubr.bf16.gmra.mrb[20].mxu1 %v1725_v2 }
 0x347   :  { %1367 = vmatprep.mubr.bf16.mxu1 %v1727_v3 }
 0x34e   :  { %1368 = vmatmul.mubr.bf16.gmra.mrb[24].mxu1 %v1731_v4 }
 0x34f   :  { %1371 = vmatprep.mubr.bf16.mxu1 %v1733_v5 }
 0x356   :  { %1372 = vmatmul.mubr.bf16.gmra.mrb[28].mxu1 %v1737_v6 }
 0x357   :  { %1423 = vmatprep.mubr.bf16.mxu1 %v1716_v16 }
 0x411   :  { %v1361_v43 = vpop.f32.mrb[16].mxu1 }
 0x412   :  { %v711_v44 = vpop.f32.mrb[17].mxu1  ;;  %v776_v46 = vmax.f32 %v1361_v43, 0.0 }
 0x413   :  { %v1362_v45 = vpop.f32.mrb[18].mxu1  ;;  %v774_v49 = vmax.f32 %v711_v44, 0.0 }
 0x414   :  { %v777_v47 = vmax.f32 %v1362_v45, 0.0  ;;  %v714_v48 = vpop.f32.mrb[19].mxu1 }
 0x415   :  { %v775_v50 = vmax.f32 %v714_v48, 0.0 }
 0x416   :  { %v791_v51 = vpack.c.bf16 %v777_v47, %v776_v46 }
 0x417   :  { %v790_v52 = vpack.c.bf16 %v775_v50, %v774_v49 }
 0x419   :  { %v1365_v53 = vpop.f32.mrb[20].mxu1  ;;  %1391 = vmatprep.mubr.bf16.mxu0 %v790_v52 }
 0x41a   :  { %v727_v54 = vpop.f32.mrb[21].mxu1  ;;  %1392 = vmatmul.mubr.bf16.vlgmr.msra.gmra.mrb[32].mxu0 %v791_v51  ;;  %v780_v55 = vmax.f32 %v1365_v53, 0.0 }
 0x41b   :  { %v1366_v16 = vpop.f32.mrb[22].mxu1  ;;  %v778_v58 = vmax.f32 %v727_v54, 0.0 }
 0x41c   :  { %v781_v56 = vmax.f32 %v1366_v16, 0.0  ;;  %v730_v57 = vpop.f32.mrb[23].mxu1 }
 0x41d   :  { %v779_v59 = vmax.f32 %v730_v57, 0.0 }
 0x41e   :  { %v793_v60 = vpack.c.bf16 %v781_v56, %v780_v55 }
 0x41f   :  { %v792_v61 = vpack.c.bf16 %v779_v59, %v778_v58 }
 0x421   :  { %v1369_v62 = vpop.f32.mrb[24].mxu1  ;;  %1395 = vmatprep.mubr.bf16.mxu0 %v792_v61 }
 0x422   :  { %v743_v63 = vpop.f32.mrb[25].mxu1  ;;  %1396 = vmatmul.mubr.bf16.gmra.mrb[36].mxu0 %v793_v60  ;;  %v784_v8 = vmax.f32 %v1369_v62, 0.0 }
 0x423   :  { %v1370_v7 = vpop.f32.mrb[26].mxu1  ;;  %v782_v11 = vmax.f32 %v743_v63, 0.0 }
 0x424   :  { %v785_v9 = vmax.f32 %v1370_v7, 0.0  ;;  %v746_v10 = vpop.f32.mrb[27].mxu1 }
 0x425   :  { %v783_v12 = vmax.f32 %v746_v10, 0.0 }
 0x426   :  { %v795_v13 = vpack.c.bf16 %v785_v9, %v784_v8 }
 0x427   :  { %v794_v14 = vpack.c.bf16 %v783_v12, %v782_v11 }
 0x429   :  { %v1373_v15 = vpop.f32.mrb[28].mxu1  ;;  %1399 = vmatprep.mubr.bf16.mxu0 %v794_v14 }
 0x42a   :  { %v759_v17 = vpop.f32.mrb[29].mxu1  ;;  %1400 = vmatmul.mubr.bf16.gmra.mrb[40].mxu0 %v795_v13  ;;  %v788_v19 = vmax.f32 %v1373_v15, 0.0 }
 0x42b   :  { %v1374_v18 = vpop.f32.mrb[30].mxu1  ;;  %v786_v22 = vmax.f32 %v759_v17, 0.0 }
 0x42c   :  { %v789_v20 = vmax.f32 %v1374_v18, 0.0  ;;  %v762_v21 = vpop.f32.mrb[31].mxu1 }
 0x42d   :  { %v787_v23 = vmax.f32 %v762_v21, 0.0 }
 0x42e   :  { %v797_v24 = vpack.c.bf16 %v789_v20, %v788_v19 }
 0x42f   :  { %v796_v25 = vpack.c.bf16 %v787_v23, %v786_v22 }
 0x431   :  { %1403 = vmatprep.mubr.bf16.mxu0 %v796_v25 }
 0x432   :  { %1404 = vmatmul.mubr.bf16.gmra.mrb[44].mxu0 %v797_v24 }
 0x4ed   :  { %v1393_v26 = vpop.f32.mrb[32].mxu0 }
 0x4ee   :  { %v905_v28 = vpop.f32.mrb[33].mxu0  ;;  %v914_v30 = vadd.f32 %v1393_v26, %v1142_v27 }
 0x4ef   :  { %v1394_v29 = vpop.f32.mrb[34].mxu0  ;;  %v906_v33 = vadd.f32 %v1142_v27, %v905_v28 }
 0x4f0   :  { %v917_v31 = vadd.f32 %v1394_v29, %v1142_v27  ;;  %v908_v32 = vpop.f32.mrb[35].mxu0 }
 0x4f1   :  { %v909_v34 = vadd.f32 %v1142_v27, %v908_v32 }
 0x4f2   :  { %v969_v35 = vpack.c.bf16 %v917_v31, %v914_v30 }
 0x4f3   :  { %v968_v36 = vpack.c.bf16 %v909_v34, %v906_v33 }
 0x4f5   :  { %v1397_v37 = vpop.f32.mrb[36].mxu0  ;;  %1407 = vmatprep.subr.bf16.mxu1 %v968_v36 }
 0x4f6   :  { %v921_v38 = vpop.f32.mrb[37].mxu0  ;;  %1408 = vmatpush3.bf16.msra.mxu1 %v968_v36  ;;  %v930_v40 = vadd.f32 %v1397_v37, %v1142_v27 }
 0x4f7   :  { %v1398_v39 = vpop.f32.mrb[38].mxu0  ;;  %1409 = vmatprep.subr.bf16.mxu1 %v969_v35  ;;  %v922_v43 = vadd.f32 %v1142_v27, %v921_v38 }
 0x4f8   :  { %v933_v41 = vadd.f32 %v1398_v39, %v1142_v27  ;;  %v924_v42 = vpop.f32.mrb[39].mxu0 }
 0x4f9   :  { %v925_v44 = vadd.f32 %v1142_v27, %v924_v42 }
 0x4fa   :  { %v971_v45 = vpack.c.bf16 %v933_v41, %v930_v40  ;;  %1410 = vmatpush3.bf16.msra.mxu1 %v969_v35 }
 0x4fb   :  { %v970_v46 = vpack.c.bf16 %v925_v44, %v922_v43 }
 0x4fd   :  { %v1401_v47 = vpop.f32.mrb[40].mxu0  ;;  %1411 = vmatprep.subr.bf16.mxu1 %v970_v46 }
 0x4fe   :  { %v937_v48 = vpop.f32.mrb[41].mxu0  ;;  %1412 = vmatpush3.bf16.msra.mxu1 %v970_v46  ;;  %v946_v50 = vadd.f32 %v1401_v47, %v1142_v27 }
 0x4ff   :  { %v1402_v49 = vpop.f32.mrb[42].mxu0  ;;  %1413 = vmatprep.subr.bf16.mxu1 %v971_v45  ;;  %v938_v53 = vadd.f32 %v1142_v27, %v937_v48 }
 0x500   :  { %v949_v51 = vadd.f32 %v1402_v49, %v1142_v27  ;;  %v940_v52 = vpop.f32.mrb[43].mxu0 }
 0x501   :  { %v941_v54 = vadd.f32 %v1142_v27, %v940_v52 }
 0x502   :  { %v973_v16 = vpack.c.bf16 %v949_v51, %v946_v50  ;;  %1414 = vmatpush3.bf16.msra.mxu1 %v971_v45 }
 0x503   :  { %v972_v55 = vpack.c.bf16 %v941_v54, %v938_v53 }
 0x505   :  { %v1405_v56 = vpop.f32.mrb[44].mxu0  ;;  %1415 = vmatprep.subr.bf16.mxu1 %v972_v55 }
 0x506   :  { %v953_v57 = vpop.f32.mrb[45].mxu0  ;;  %1416 = vmatpush3.bf16.msra.mxu1 %v972_v55  ;;  %v962_v59 = vadd.f32 %v1405_v56, %v1142_v27 }
 0x507   :  { %v1406_v58 = vpop.f32.mrb[46].mxu0  ;;  %1417 = vmatprep.subr.bf16.mxu1 %v973_v16  ;;  %v954_v62 = vadd.f32 %v1142_v27, %v953_v57 }
 0x508   :  { %v965_v60 = vadd.f32 %v1406_v58, %v1142_v27  ;;  %v956_v61 = vpop.f32.mrb[47].mxu0 }
 0x509   :  { %v957_v63 = vadd.f32 %v1142_v27, %v956_v61 }
 0x50a   :  { %v975_v7 = vpack.c.bf16 %v965_v60, %v962_v59  ;;  %1418 = vmatpush3.bf16.msra.mxu1 %v973_v16 }
 0x50b   :  { %v974_v8 = vpack.c.bf16 %v957_v63, %v954_v62 }
 0x50d   :  { %1419 = vmatprep.subr.bf16.mxu1 %v974_v8 }
 0x50e   :  { %1420 = vmatpush3.bf16.msra.mxu1 %v974_v8 }
 0x50f   :  { %1421 = vmatprep.subr.bf16.mxu1 %v975_v7 }
 0x512   :  { %1422 = vmatpush3.bf16.msra.mxu1 %v975_v7 }
 0x515   :  { %1424 = vmatmul.mubr.bf16.vlgmr.msra.gmra.mrb[32].mxu1 %v1719_v0 }
 0x516   :  { %1427 = vmatprep.mubr.bf16.mxu1 %v1721_v1 }
 0x51d   :  { %1428 = vmatmul.mubr.bf16.gmra.mrb[36].mxu1 %v1725_v2 }
 0x51e   :  { %1431 = vmatprep.mubr.bf16.mxu1 %v1727_v3 }
 0x525   :  { %1432 = vmatmul.mubr.bf16.gmra.mrb[40].mxu1 %v1731_v4 }
 0x526   :  { %1435 = vmatprep.mubr.bf16.mxu1 %v1733_v5 }
 0x52d   :  { %1436 = vmatmul.mubr.bf16.gmra.mrb[44].mxu1 %v1737_v6 }
 0x5e8   :  { %v1425_v9 = vpop.f32.mrb[32].mxu1 }
 0x5e9   :  { %1075 = vst [vmem:[#allocation10 + $0x10] sm:$0xff] %v1425_v9  ;;  %v1010_v10 = vpop.f32.mrb[33].mxu1 }
 0x5ea   :  { %1073 = vst [vmem:[#allocation10] sm:$0xff] %v1010_v10  ;;  %v1426_v11 = vpop.f32.mrb[34].mxu1 }
 0x5eb   :  { %1076 = vst [vmem:[#allocation10 + $0x18] sm:$0xff] %v1426_v11  ;;  %v1013_v12 = vpop.f32.mrb[35].mxu1 }
 0x5ec   :  { %1074 = vst [vmem:[#allocation10 + $0x8] sm:$0xff] %v1013_v12 }
 0x5f0   :  { %v1429_v0 = vpop.f32.mrb[36].mxu1 }
 0x5f1   :  { %1079 = vst [vmem:[#allocation10 + $0x30] sm:$0xff] %v1429_v0  ;;  %v1026_v1 = vpop.f32.mrb[37].mxu1 }
 0x5f2   :  { %1077 = vst [vmem:[#allocation10 + $0x20] sm:$0xff] %v1026_v1  ;;  %v1430_v2 = vpop.f32.mrb[38].mxu1 }
 0x5f3   :  { %1080 = vst [vmem:[#allocation10 + $0x38] sm:$0xff] %v1430_v2  ;;  %v1029_v3 = vpop.f32.mrb[39].mxu1 }
 0x5f4   :  { %1078 = vst [vmem:[#allocation10 + $0x28] sm:$0xff] %v1029_v3 }
 0x5f8   :  { %v1433_v4 = vpop.f32.mrb[40].mxu1 }
 0x5f9   :  { %1083 = vst [vmem:[#allocation10 + $0x50] sm:$0xff] %v1433_v4  ;;  %v1042_v5 = vpop.f32.mrb[41].mxu1 }
 0x5fa   :  { %1081 = vst [vmem:[#allocation10 + $0x40] sm:$0xff] %v1042_v5  ;;  %v1434_v6 = vpop.f32.mrb[42].mxu1 }
 0x5fb   :  { %1084 = vst [vmem:[#allocation10 + $0x58] sm:$0xff] %v1434_v6  ;;  %v1045_v13 = vpop.f32.mrb[43].mxu1 }
 0x5fc   :  { %1082 = vst [vmem:[#allocation10 + $0x48] sm:$0xff] %v1045_v13 }
 0x600   :  { %v1437_v14 = vpop.f32.mrb[44].mxu1 }
 0x601   :  { %1087 = vst [vmem:[#allocation10 + $0x70] sm:$0xff] %v1437_v14  ;;  %v1058_v15 = vpop.f32.mrb[45].mxu1 }
 0x602   :  { %1085 = vst [vmem:[#allocation10 + $0x60] sm:$0xff] %v1058_v15  ;;  %v1438_v17 = vpop.f32.mrb[46].mxu1 }
 0x603   :  { %1088 = vst [vmem:[#allocation10 + $0x78] sm:$0xff] %v1438_v17  ;;  %v1061_v18 = vpop.f32.mrb[47].mxu1 }
 0x604   :  { %1086 = vst [vmem:[#allocation10 + $0x68] sm:$0xff] %v1061_v18 }
 0x605   :  { %1589 = shalt.err (!%p1586_p8)
}
 0x606   :  { %s1590_s16 = scalar_lea.hbm %s1772_s4, 2048 }
 0x607   :  { %p1591_p9 = scmp.ne.s32.totalorder %s1772_s4, %s1590_s16  ;;  %p1594_p10 = scmp.lt.u32.totalorder %s1590_s16, %s1772_s4 }
 0x609   :  { %p1596_p11 = pnand %p1594_p10, %p1591_p9 }
 0x60b   :  { %1599 = shalt.err (!%p1596_p11)
}
 0x60c   :  { %s1617_s22 = smov 128   ;;  %s1618_s23 = smov 8  }
 0x60d   :  { %1100 = dma.vmem_to_hbm [thread:$0]  %s1095_s1, 2048, %s1772_s4, [#allocation4], %s1617_s22, %s1617_s22, %s1618_s23  }
 0x60e   :  { %1606 = dma.done.wait [#allocation4], 2048  }
 0x60f   :  { %1607 = vsyncadd [#allocation4], 4294965248 }
 0x610   :  { %1104 = vsyncpa [#allocation3], 1 }
 0x611   :  { %1105 = vsyncpa [#allocation6], 1 }
 0x612   :  { %1106 = vsyncpa [#allocation9], 1 }
 0x613   :  { %1107 = vsyncpa [#allocation4], 1 }

</bundles_post_ra>
